<compile_context>
chip_gen: v7x
topology: tpu7x:2x2x1
jax: 0.10.0
libtpu: 0.0.40
codegen_flags: <defaults>
</compile_context>

<pallas_src>
import jax
import jax.numpy as jnp
import numpy as np
from jax.experimental import pallas as pl
from jax.experimental.pallas import tpu as pltpu

LANE = 128
SUBLANE = 8
MAX_BLOCK_ROWS = 2048      # (2048,128) f32 tile = 1 MiB
NUM_CORE_SPLITS = 2        # leading "parallel" grid axis (2 TCs on v7x)


def _make_dice_kernel(rows, block_rows, tiles_per_core, num_tiles):
    groups = block_rows // SUBLANE
    # Masking is only needed when the tail tile is partial, or when the grid
    # is over-provisioned and some (p, j) slots map to clamped duplicate tiles.
    need_mask = (rows % block_rows != 0) or (
        NUM_CORE_SPLITS * tiles_per_core != num_tiles
    )

    def kernel(x_ref, t_ref, inter_ref, sum_ref):
        j = pl.program_id(1)

        @pl.when(j == 0)
        def _():
            inter_ref[...] = jnp.zeros_like(inter_ref)
            sum_ref[...] = jnp.zeros_like(sum_ref)

        x = x_ref[0].astype(jnp.float32)        # (block_rows, LANE)
        t = t_ref[0].astype(jnp.float32)

        if need_mask:
            p = pl.program_id(0)
            tile = p * tiles_per_core + j       # un-clamped logical tile id
            row0 = tile * block_rows
            row_ids = row0 + jax.lax.broadcasted_iota(
                jnp.int32, (block_rows, LANE), 0
            )
            valid = row_ids < rows
            x = jnp.where(valid, x, 0.0)
            t = jnp.where(valid, t, 0.0)

        # Pure-VPU per-tile reduction into one vreg-shaped (8,128) partial.
        xr = x.reshape(groups, SUBLANE, LANE)
        tr = t.reshape(groups, SUBLANE, LANE)
        inter_ref[0] += jnp.sum(xr * tr, axis=0)
        sum_ref[0] += jnp.sum(xr + tr, axis=0)

    return kernel


def dice_loss_per_sample(inputs, targets):
    """Exact forward of DiceLossPerSample. inputs/targets: NCHW arrays."""
    assert inputs.shape == targets.shape
    batch = inputs.shape[0]
    n = 1
    for d in inputs.shape[1:]:
        n *= d

    if n % (SUBLANE * LANE) == 0:
        # Free bitcast of the full buffers; sample 0 is selected by the
        # index_map -> no extra HBM pass, inputs stay in native dtype.
        rows = n // LANE
        x3 = inputs.reshape(batch, rows, LANE)
        t3 = targets.reshape(batch, rows, LANE)
    else:
        # Awkward sizes: flatten sample 0 and zero-pad to an (8,128) multiple
        # (zeros are neutral for all three sums).
        x0 = inputs[0].reshape(-1)
        t0 = targets[0].reshape(-1)
        pad = (-n) % (SUBLANE * LANE)
        if pad:
            x0 = jnp.pad(x0, (0, pad))
            t0 = jnp.pad(t0, (0, pad))
        rows = x0.shape[0] // LANE
        x3 = x0.reshape(1, rows, LANE)
        t3 = t0.reshape(1, rows, LANE)

    block_rows = min(MAX_BLOCK_ROWS, rows)          # multiple of 8 by construction
    num_tiles = -(-rows // block_rows)
    tiles_per_core = -(-num_tiles // NUM_CORE_SPLITS)

    def in_map(p, j):
        # Clamp so the DMA window never starts past the array; clamped
        # (duplicate) tiles are fully zero-masked inside the kernel.
        return (0, jnp.minimum(p * tiles_per_core + j, num_tiles - 1), 0)

    kernel = _make_dice_kernel(rows, block_rows, tiles_per_core, num_tiles)

    out_inter, out_sum = pl.pallas_call(
        kernel,
        out_shape=(
            jax.ShapeDtypeStruct((NUM_CORE_SPLITS, SUBLANE, LANE), jnp.float32),
            jax.ShapeDtypeStruct((NUM_CORE_SPLITS, SUBLANE, LANE), jnp.float32),
        ),
        grid_spec=pltpu.PrefetchScalarGridSpec(
            num_scalar_prefetch=0,
            grid=(NUM_CORE_SPLITS, tiles_per_core),
            in_specs=[
                pl.BlockSpec((1, block_rows, LANE), in_map),
                pl.BlockSpec((1, block_rows, LANE), in_map),
            ],
            out_specs=[
                pl.BlockSpec((1, SUBLANE, LANE), lambda p, j: (p, 0, 0)),
                pl.BlockSpec((1, SUBLANE, LANE), lambda p, j: (p, 0, 0)),
            ],
        ),
        compiler_params=pltpu.CompilerParams(
            dimension_semantics=("parallel", "arbitrary"),
        ),
    )(x3, t3)

    # Tiny final reduction of the per-core vreg partials (2*8*128 elements).
    smooth = jnp.float32(1.0)
    intersection = jnp.sum(out_inter)
    denom = jnp.sum(out_sum)
    dice = (2.0 * intersection + smooth) / (denom + smooth)
    return 1.0 - dice


def _reference(inputs, targets):
    # Pure-JAX mirror of the PyTorch forward (incl. the [0]-indexing quirk).
    smooth = 1.0
    iflat = inputs[0].reshape(-1).astype(jnp.float32)
    tflat = targets[0].reshape(-1).astype(jnp.float32)
    intersection = jnp.sum(iflat * tflat)
    a_sum = jnp.sum(iflat)
    b_sum = jnp.sum(tflat)
    dice = (2.0 * intersection + smooth) / (a_sum + b_sum + smooth)
    return 1.0 - dice  # the /batch_size and summed identical terms cancel


if __name__ == "__main__":
    key = jax.random.PRNGKey(0)
    k1, k2 = jax.random.split(key)

    # batch=2, channels=4, spatial=16x16 (NCHW, like the PyTorch module)
    x = jax.random.uniform(k1, (2, 4, 16, 16), dtype=jnp.float32)  # "probabilities"
    t = (jax.random.uniform(k2, (2, 4, 16, 16), dtype=jnp.float32) > 0.5).astype(
        jnp.float32
    )  # binary targets

    loss = dice_loss_per_sample(x, t)
    loss = jax.block_until_ready(loss)

    ref = _reference(x, t)
    np.testing.assert_allclose(np.asarray(loss), np.asarray(ref), rtol=1e-5, atol=1e-5)

    print("KERNEL_OK")
</pallas_src>

<mosaic_0001>
module attributes {stable_mosaic.version = 11 : i64} {
  func.func @kernel(%arg0: i32, %arg1: i32, %arg2: memref<1x8x128xf32, #tpu.memory_space<vmem>>, %arg3: memref<1x8x128xf32, #tpu.memory_space<vmem>>, %arg4: memref<1x8x128xf32, #tpu.memory_space<vmem>>, %arg5: memref<1x8x128xf32, #tpu.memory_space<vmem>>) attributes {dimension_semantics = [#tpu.dimension_semantics<parallel>, #tpu.dimension_semantics<arbitrary>], iteration_bounds = array<i64: 2, 1>, scalar_prefetch = 0 : i64, scratch_operands = 0 : i64, tpu.core_type = #tpu.core_type<tc>, window_params = [{transform_indices = @transform_0, window_bounds = array<i64: 1, 8, 128>}, {transform_indices = @transform_1, window_bounds = array<i64: 1, 8, 128>}, {transform_indices = @transform_2, window_bounds = array<i64: 1, 8, 128>}, {transform_indices = @transform_3, window_bounds = array<i64: 1, 8, 128>}]} {
    %c0_i32 = arith.constant 0 : i32
    %0 = arith.cmpi eq, %arg1, %c0_i32 : i32
    %1 = arith.extui %0 : i1 to i32
    %c0_i32_0 = arith.constant 0 : i32
    %2 = arith.cmpi ne, %1, %c0_i32_0 : i32
    scf.if %2 {
      %cst_22 = arith.constant 0.000000e+00 : f32
      %37 = vector.broadcast %cst_22 : f32 to vector<1x8x128xf32>
      %c0_23 = arith.constant 0 : index
      %c0_24 = arith.constant 0 : index
      %c0_25 = arith.constant 0 : index
      %38 = vector.load %arg4[%c0_23, %c0_24, %c0_25] : memref<1x8x128xf32, #tpu.memory_space<vmem>>, vector<1x8x128xf32>
      tpu.vector_store %arg4[%c0_23, %c0_24, %c0_25], %37 {strides = array<i32>} : memref<1x8x128xf32, #tpu.memory_space<vmem>>, vector<1x8x128xf32>,
      %cst_26 = arith.constant 0.000000e+00 : f32
      %39 = vector.broadcast %cst_26 : f32 to vector<1x8x128xf32>
      %c0_27 = arith.constant 0 : index
      %c0_28 = arith.constant 0 : index
      %c0_29 = arith.constant 0 : index
      %40 = vector.load %arg5[%c0_27, %c0_28, %c0_29] : memref<1x8x128xf32, #tpu.memory_space<vmem>>, vector<1x8x128xf32>
      tpu.vector_store %arg5[%c0_27, %c0_28, %c0_29], %39 {strides = array<i32>} : memref<1x8x128xf32, #tpu.memory_space<vmem>>, vector<1x8x128xf32>,
    } else {
    }
    %c0 = arith.constant 0 : index
    %c0_1 = arith.constant 0 : index
    %c0_2 = arith.constant 0 : index
    %3 = vector.load %arg2[%c0, %c0_1, %c0_2] : memref<1x8x128xf32, #tpu.memory_space<vmem>>, vector<1x8x128xf32>
    %4 = vector.shape_cast %3 : vector<1x8x128xf32> to vector<8x128xf32>
    %c0_3 = arith.constant 0 : index
    %c0_4 = arith.constant 0 : index
    %c0_5 = arith.constant 0 : index
    %5 = vector.load %arg3[%c0_3, %c0_4, %c0_5] : memref<1x8x128xf32, #tpu.memory_space<vmem>>, vector<1x8x128xf32>
    %6 = vector.shape_cast %5 : vector<1x8x128xf32> to vector<8x128xf32>
    %c1_i32 = arith.constant 1 : i32
    %7 = arith.muli %arg0, %c1_i32 : i32
    %8 = arith.addi %7, %arg1 : i32
    %c8_i32 = arith.constant 8 : i32
    %9 = arith.muli %8, %c8_i32 : i32
    %10 = tpu.iota {dimensions = array<i32: 0>} : vector<8x128xi32>
    %11 = vector.broadcast %9 : i32 to vector<8x128xi32>
    %12 = arith.addi %11, %10 : vector<8x128xi32>
    %c8_i32_6 = arith.constant 8 : i32
    %13 = vector.broadcast %c8_i32_6 : i32 to vector<8x128xi32>
    %14 = arith.cmpi slt, %12, %13 : vector<8x128xi32>
    %cst = arith.constant 0.000000e+00 : f32
    %15 = vector.broadcast %cst : f32 to vector<8x128xf32>
    %16 = arith.select %14, %4, %15 : vector<8x128xi1>, vector<8x128xf32>
    %cst_7 = arith.constant 0.000000e+00 : f32
    %17 = vector.broadcast %cst_7 : f32 to vector<8x128xf32>
    %18 = arith.select %14, %6, %17 : vector<8x128xi1>, vector<8x128xf32>
    %19 = vector.shape_cast %16 : vector<8x128xf32> to vector<1x8x128xf32>
    %20 = vector.shape_cast %18 : vector<8x128xf32> to vector<1x8x128xf32>
    %c0_8 = arith.constant 0 : index
    %c0_9 = arith.constant 0 : index
    %c0_10 = arith.constant 0 : index
    %21 = vector.load %arg4[%c0_8, %c0_9, %c0_10] : memref<1x8x128xf32, #tpu.memory_space<vmem>>, vector<1x8x128xf32>
    %22 = vector.shape_cast %21 : vector<1x8x128xf32> to vector<8x128xf32>
    %23 = arith.mulf %19, %20 : vector<1x8x128xf32>
    %cst_11 = arith.constant dense<0.000000e+00> : vector<8x128xf32>
    %24 = vector.multi_reduction <add>, %23, %cst_11 [0] : vector<1x8x128xf32> to vector<8x128xf32>
    %25 = arith.addf %22, %24 : vector<8x128xf32>
    %c0_12 = arith.constant 0 : index
    %c0_13 = arith.constant 0 : index
    %c0_14 = arith.constant 0 : index
    %26 = vector.load %arg4[%c0_12, %c0_13, %c0_14] : memref<1x8x128xf32, #tpu.memory_space<vmem>>, vector<1x8x128xf32>
    %27 = vector.shape_cast %26 : vector<1x8x128xf32> to vector<8x128xf32>
    %28 = vector.shape_cast %25 : vector<8x128xf32> to vector<1x8x128xf32>
    tpu.vector_store %arg4[%c0_12, %c0_13, %c0_14], %28 {strides = array<i32>} : memref<1x8x128xf32, #tpu.memory_space<vmem>>, vector<1x8x128xf32>,
    %c0_15 = arith.constant 0 : index
    %c0_16 = arith.constant 0 : index
    %c0_17 = arith.constant 0 : index
    %29 = vector.load %arg5[%c0_15, %c0_16, %c0_17] : memref<1x8x128xf32, #tpu.memory_space<vmem>>, vector<1x8x128xf32>
    %30 = vector.shape_cast %29 : vector<1x8x128xf32> to vector<8x128xf32>
    %31 = arith.addf %19, %20 : vector<1x8x128xf32>
    %cst_18 = arith.constant dense<0.000000e+00> : vector<8x128xf32>
    %32 = vector.multi_reduction <add>, %31, %cst_18 [0] : vector<1x8x128xf32> to vector<8x128xf32>
    %33 = arith.addf %30, %32 : vector<8x128xf32>
    %c0_19 = arith.constant 0 : index
    %c0_20 = arith.constant 0 : index
    %c0_21 = arith.constant 0 : index
    %34 = vector.load %arg5[%c0_19, %c0_20, %c0_21] : memref<1x8x128xf32, #tpu.memory_space<vmem>>, vector<1x8x128xf32>
    %35 = vector.shape_cast %34 : vector<1x8x128xf32> to vector<8x128xf32>
    %36 = vector.shape_cast %33 : vector<8x128xf32> to vector<1x8x128xf32>
    tpu.vector_store %arg5[%c0_19, %c0_20, %c0_21], %36 {strides = array<i32>} : memref<1x8x128xf32, #tpu.memory_space<vmem>>, vector<1x8x128xf32>,
    return
  }
  func.func @transform_0(%arg0: i32, %arg1: i32) -> (i32, i32, i32) {
    %c1_i32 = arith.constant 1 : i32
    %0 = arith.muli %arg0, %c1_i32 : i32
    %1 = arith.addi %0, %arg1 : i32
    %c0_i32 = arith.constant 0 : i32
    %2 = arith.minsi %1, %c0_i32 : i32
    %c0_i32_0 = arith.constant 0 : i32
    %c0_i32_1 = arith.constant 0 : i32
    %c0_i32_2 = arith.constant 0 : i32
    return %c0_i32_0, %2, %c0_i32_1 : i32, i32, i32
  }
  func.func @transform_1(%arg0: i32, %arg1: i32) -> (i32, i32, i32) {
    %c1_i32 = arith.constant 1 : i32
    %0 = arith.muli %arg0, %c1_i32 : i32
    %1 = arith.addi %0, %arg1 : i32
    %c0_i32 = arith.constant 0 : i32
    %2 = arith.minsi %1, %c0_i32 : i32
    %c0_i32_0 = arith.constant 0 : i32
    %c0_i32_1 = arith.constant 0 : i32
    %c0_i32_2 = arith.constant 0 : i32
    return %c0_i32_0, %2, %c0_i32_1 : i32, i32, i32
  }
  func.func @transform_2(%arg0: i32, %arg1: i32) -> (i32, i32, i32) {
    %c0_i32 = arith.constant 0 : i32
    %c0_i32_0 = arith.constant 0 : i32
    %c0_i32_1 = arith.constant 0 : i32
    return %arg0, %c0_i32, %c0_i32_0 : i32, i32, i32
  }
  func.func @transform_3(%arg0: i32, %arg1: i32) -> (i32, i32, i32) {
    %c0_i32 = arith.constant 0 : i32
    %c0_i32_0 = arith.constant 0 : i32
    %c0_i32_1 = arith.constant 0 : i32
    return %arg0, %c0_i32, %c0_i32_0 : i32, i32, i32
  }
}

</mosaic_0001>

<bundles_post_ra>
// kernel: tpu_custom_call.1
= control target key start
LH: loop header
LB: loop body
LE: loop exit
PB: predicated region body
PF: predicated region fallthrough
CT: control target
= control target key end

     0   :  { %9 = vsyncpa [#allocation3], 0  ;;  %s1045_s0 = inlined_call_operand.hbm [shape: f32[2,8,128], index: 0, kind: input, shape index: {}]   ;;  %s1046_s1 = inlined_call_operand.hbm [shape: f32[2,8,128], index: 1, kind: input, shape index: {}]   ;;  %s1047_s2 = inlined_call_operand.hbm [shape: f32[2,8,128], index: 2, kind: output, shape index: {0}]   ;;  %s1048_s3 = inlined_call_operand.hbm [shape: f32[2,8,128], index: 3, kind: output, shape index: {1}]  }
   0x1   :  { %11 = vsyncpa [#allocation3 + $0x1], 0 }
   0x2   :  { %12 = vsyncpa [#allocation6], 0 }
   0x3   :  { %14 = vsyncpa [#allocation6 + $0x1], 0 }
   0x4   :  { %15 = vsyncpa [#allocation4], 0 }
   0x5   :  { %17 = vsyncpa [#allocation4 + $0x1], 0 }
   0x6   :  { %18 = vsyncpa [#allocation9], 0 }
   0x7   :  { %20 = vsyncpa [#allocation9 + $0x1], 0  ;;  %s804_s12 = smov 0   ;;  %s806_s13 = smov 0  }
   0x8   :  { %s808_s14 = smov 0   ;;  %s810_s15 = smov 0  }
   0x9   :  { %s812_s16 = smov 0   ;;  %s814_s17 = smov 0  }
   0xa   :  { %s816_s18 = smov 0   ;;  %s818_s19 = smov 0  }
   0xb LB: > { %s462_s20 = sadd.s32 4294967295, %s778_s19   ;;  %s463_s21 = sadd.s32 4294967294, %s778_s19   ;;  %s778_s19 = sphi %s818_s19, %s26_s19   ;;  %s774_s18 = sphi %s816_s18, %s1069_s18   ;;  %s770_s17 = sphi %s814_s17, %s1068_s17   ;;  %s766_s16 = sphi %s812_s16, %s1035_s16   ;;  %s762_s15 = sphi %s810_s15, %s1067_s15   ;;  %s758_s14 = sphi %s808_s14, %s1066_s14   ;;  %s754_s13 = sphi %s806_s13, %s1065_s13   ;;  %s750_s12 = sphi %s804_s12, %s1064_s12  }
   0xc   : > { %s38_s22 = sadd.s32 1, %s774_s18  ;;  %p747_p1 = scmp.ne.s32.totalorder %s766_s16, 0 }
   0xd   : > { %p40_p0 = scmp.ge.s32.totalorder %s38_s22, 2  ;;  %p59_p2 = scmp.eq.s32.totalorder %s778_s19, 0 }
   0xe   : > { %p64_p3 = scmp.ne.s32.totalorder %s766_s16, %s762_s15  ;;  %p65_p5 = scmp.eq.s32.totalorder %s462_s20, 0 }
   0xf   : > { %s1071_s22 = smov (%p40_p0, %s38_s22), 0  ;;  %p850_p4 = por %p747_p1, %p59_p2 }
  0x10   : > { %p854_p6 = por %p65_p5, %p64_p3  ;;  %s106_s25 = ssub.s32 %s774_s18, %s1071_s22 }
  0x11   : > { %p107_p7 = scmp.eq.s32.totalorder %s106_s25, 0  ;;  %s109_s26 = sadd.s32 1, %s758_s14 }
  0x12   : > { %s1052_s24 = scalar_select %p854_p6, 1, 0 }
  0x13   : > { %s862_s27 = scalar_select %p107_p7, %s758_s14, %s109_s26  }
  0x14   : > { %p119_p8 = scmp.ne.s32.totalorder %s758_s14, %s754_s13  ;;  %p120_p9 = scmp.eq.s32.totalorder %s462_s20, 1 }
  0x15   : > { %p125_p10 = scmp.ne.s32.totalorder %s754_s13, %s750_s12  ;;  %p126_p11 = scmp.eq.s32.totalorder %s463_s21, 1 }
  0x16   : > { %p868_p12 = por %p120_p9, %p119_p8  ;;  %p504_p1 = scmp.lt.s32.totalorder %s778_s19, 2 }
  0x17   : > { %p873_p0 = por %p126_p11, %p125_p10  ;;  %s780_s30 = smov [#allocation2]  }
  0x18   : > { %s1053_s28 = scalar_select %p868_p12, 1, 0 }
  0x19   : > { %s1054_s29 = scalar_select %p873_p0, 1, 0 }
  0x1a   : > { %s186_s4 = sshll.u32 %s780_s30, 4  ;;  %p880_p2 = pnand %p504_p1, %p850_p4  ;;  %s187_s4 = int_to_ptr.vmem [resolvable:$true] %s186_s4 }
  0x1b   : > { %s579_s8 = scalar_lea.hbm %s1045_s0, 128  ;;  %s584_s20 = scalar_lea.hbm %s1045_s0, 256 }
  0x1c   : > { %p580_p7 = scmp.ne.s32.totalorder %s1045_s0, %s579_s8  ;;  %p581_p8 = pneg %p880_p2 }
  0x1d   : > { %p586_p10 = scmp.lt.u32.totalorder %s584_s20, %s579_s8  ;;  %p588_p11 = scmp.lt.u32.totalorder %s579_s8, %s1045_s0 }
  0x1e   : > { %p582_p4 = pnand %p581_p8, %p580_p7 }
  0x1f   : > { %p589_p1 = por %p588_p11, %p586_p10 }
  0x20   : > { %p583_p9 = pneg %p582_p4 }
  0x22   : > { %p590_p13 = pnand %p589_p1, %p583_p9 }
  0x24   : > { %593 = shalt.err (!%p590_p13)
}
  0x25   : > { %s594_s25 = scalar_lea.vmem %s187_s4, 128  ;;  %s601_s26 = scalar_lea.vmem %s187_s4, 256 }
  0x26   : > { %p595_p3 = scmp.ne.s32.totalorder %s187_s4, %s594_s25  ;;  %p602_p4 = scmp.lt.s32.totalorder %s187_s4, %s187_s4 }
  0x27   : > { %p603_p0 = scmp.lt.s32.totalorder %s601_s26, %s594_s25 }
  0x28   : > { %p597_p5 = pnand %p595_p3, %p581_p8 }
  0x29   : > { %p604_p12 = por %p603_p0, %p602_p4 }
  0x2a   : > { %p598_p7 = pneg %p597_p5 }
  0x2c   : > { %p605_p6 = pnand %p604_p12, %p598_p7 }
  0x2e   : > { %608 = shalt.err (!%p605_p6)
}
  0x2f   : > { %493 = dma.hbm_to_vmem [thread:$0]  (!%p880_p2), %s1045_s0, 128, %s187_s4, [#allocation3]  }
  0x30   : > { %p1056_p13 = scmp.lt.s32.totalorder %s778_s19, 3  ;;  %p1057_p9 = scmp.ge.s32.totalorder %s778_s19, 1 }
  0x31   : > { %s781_s8 = smov [#allocation5]   ;;  %s609_s15 = scalar_lea.hbm %s1046_s1, 128 }
  0x32   : > { %p915_p10 = pnand %p1057_p9, %p1056_p13  ;;  %s207_s9 = sshll.u32 %s781_s8, 4  ;;  %s208_s9 = int_to_ptr.vmem [resolvable:$true] %s207_s9 }
  0x33   : > { %p610_p6 = scmp.ne.s32.totalorder %s1046_s1, %s609_s15  ;;  %s614_s25 = scalar_lea.hbm %s1046_s1, 256 }
  0x34   : > { %s1058_s7 = scalar_select %p915_p10, 1, 0 }
  0x35   : > { %p612_p12 = pnand %p610_p6, %p581_p8  ;;  %p616_p3 = scmp.lt.u32.totalorder %s614_s25, %s609_s15 }
  0x36   : > { %p618_p5 = scmp.lt.u32.totalorder %s609_s15, %s1046_s1 }
  0x37   : > { %p613_p0 = pneg %p612_p12 }
  0x38   : > { %p619_p11 = por %p618_p5, %p616_p3 }
  0x3a   : > { %p620_p1 = pnand %p619_p11, %p613_p0 }
  0x3c   : > { %623 = shalt.err (!%p620_p1)
}
  0x3d   : > { %s624_s6 = scalar_lea.vmem %s208_s9, 128  ;;  %s631_s8 = scalar_lea.vmem %s208_s9, 256 }
  0x3e   : > { %p625_p7 = scmp.ne.s32.totalorder %s208_s9, %s624_s6  ;;  %p632_p9 = scmp.lt.s32.totalorder %s208_s9, %s208_s9 }
  0x3f   : > { %p633_p6 = scmp.lt.s32.totalorder %s631_s8, %s624_s6 }
  0x40   : > { %p627_p4 = pnand %p625_p7, %p581_p8 }
  0x41   : > { %p634_p12 = por %p633_p6, %p632_p9 }
  0x42   : > { %p628_p13 = pneg %p627_p4 }
  0x44   : > { %p635_p10 = pnand %p634_p12, %p628_p13 }
  0x46   : > { %638 = shalt.err (!%p635_p10)
}
  0x47   : > { %496 = dma.hbm_to_vmem [thread:$0]  (!%p880_p2), %s1046_s1, 128, %s208_s9, [#allocation6]  }
  0x48   : > { %p1059_p0 = scmp.ne.s32.totalorder %s1058_s7, 0 }
  0x49   : > { %s218_s15 = sand.u32 (!%p1059_p0), 1, %s766_s16   ;;  %p1060_p8 = scmp.ne.s32.totalorder (!%p1059_p0), %s1052_s24, 0 }
  0x4a   : > { %216 = sbr.rel (%p1059_p0) target bundleno = 136 (0x88), region = 28  ;;  %s471_s20 = sshll.u32 (!%p1059_p0), %s218_s15, 3 }
  0x4b   : > { %s219_s21 = scalar_lea.sflag (!%p1059_p0), [#allocation3], %s218_s15  ;;  %s222_s4 = scalar_lea.vmem (!%p1059_p0), [#allocation2], %s471_s20 }
  0x51   : > { %732 = dma.done.wait (%p1060_p8), %s219_s21, 128  }
  0x52   : > { %734 = vsyncadd (%p1060_p8), %s219_s21, 4294967168  ;;  %s228_s5 = scalar_lea.sflag [#allocation6], %s218_s15  ;;  %s231_s23 = scalar_lea.vmem [#allocation5], %s471_s20 }
  0x53   : > { %736 = dma.done.wait (%p1060_p8), %s228_s5, 128  }
  0x54   : > { %738 = vsyncadd (%p1060_p8), %s228_s5, 4294967168  ;;  %s954_s7 = sand.u32 1, %s754_s13   ;;  %s475_s9 = sshll.u32 %s770_s17, 3  ;;  %v280_v0 = vlaneseq  ;;  %v276_v4 = vld [vmem:[%s222_s4] sm:$0xff]  ;;  %v277_v5 = vld [vmem:[%s231_s23] sm:$0xff] }
  0x55   : > { %v282_v1 = vstv %s475_s9  ;;  %s473_s25 = sshll.u32 %s954_s7, 3  ;;  %s478_s26 = sshll.u32 %s770_s17, 7 }
  0x56   : > { %v281_v2 = vshrl.u32 %v280_v0, 7  ;;  %s256_s24 = scalar_lea.vmem [#allocation7], %s473_s25  ;;  %s263_s6 = scalar_lea.vmem [#allocation8], %s473_s25 }
  0x57   : > { %s316_s30 = sshll.u32 %s256_s24, 4  ;;  %s329_s8 = sshll.u32 %s263_s6, 4  ;;  %s964_s30 = int_to_ptr.vmem [resolvable:$true] %s316_s30  ;;  %s971_s8 = int_to_ptr.vmem [resolvable:$true] %s329_s8 }
  0x58   : > { %v283_v3 = vadd.s32 %v282_v1, %v281_v2  ;;  %s962_s15 = scalar_lea.hbm %s1047_s2, %s478_s26  ;;  %s969_s17 = scalar_lea.hbm %s1048_s3, %s478_s26 }
  0x59   : > { %s298_s4 = scalar_lea.sflag [#allocation4], %s954_s7  ;;  %s639_s5 = scalar_lea.vmem %s964_s30, 128 }
  0x5a   : > { %vm284_vm0 = vcmp.lt.s32.totalorder %v283_v3, 8  ;;  %p640_p2 = scmp.ne.s32.totalorder %s964_s30, %s639_s5  ;;  %p1061_p10 = scmp.ne.s32.totalorder %s1053_s28, 0 }
  0x5b   : > { %v285_v6 = vsel %vm284_vm0, %v276_v4, 0.0  ;;  %v286_v7 = vsel %vm284_vm0, %v277_v5, 0.0  ;;  %s782_s23 = smov [#allocation7]  }
  0x5c   : > { %v288_v8 = vmul.f32 %v286_v7, %v285_v6  ;;  %v293_v9 = vadd.f32 %v286_v7, %v285_v6  ;;  %p641_p3 = pnand %p640_p2, %p1061_p10  ;;  %s643_s9 = sshll.u32 %s782_s23, 4  ;;  %s644_s9 = int_to_ptr.vmem [resolvable:$false] %s643_s9 }
  0x5d   : > { %s645_s25 = scalar_lea.vmem %s644_s9, 256  ;;  %p646_p11 = scmp.lt.s32.totalorder %s964_s30, %s644_s9 }
  0x5e   : > { %291 = vst [vmem:[%s256_s24] sm:$0xff] %v288_v8  ;;  %296 = vst [vmem:[%s263_s6] sm:$0xff] %v293_v9  ;;  %p642_p5 = pneg %p641_p3  ;;  %p647_p1 = scmp.lt.s32.totalorder %s645_s25, %s639_s5 }
  0x60   : > { %p648_p7 = por %p647_p1, %p646_p11 }
  0x62   : > { %p649_p4 = pnand %p648_p7, %p642_p5 }
  0x64   : > { %652 = shalt.err (!%p649_p4)
}
  0x65   : > { %s653_s26 = scalar_lea.hbm %s962_s15, 128  ;;  %s657_s10 = scalar_lea.hbm %s1047_s2, 256 }
  0x66   : > { %p654_p13 = scmp.ne.s32.totalorder %s962_s15, %s653_s26  ;;  %p658_p12 = scmp.lt.u32.totalorder %s962_s15, %s1047_s2 }
  0x67   : > { %p659_p0 = scmp.lt.u32.totalorder %s657_s10, %s653_s26  ;;  %p661_p2 = scmp.lt.u32.totalorder %s653_s26, %s962_s15 }
  0x68   : > { %p655_p9 = pnand %p654_p13, %p1061_p10 }
  0x69   : > { %p660_p8 = por %p659_p0, %p658_p12 }
  0x6a   : > { %p656_p6 = pneg %p655_p9 }
  0x6b   : > { %p662_p3 = por %p661_p2, %p660_p8 }
  0x6d   : > { %p663_p5 = pnand %p662_p3, %p656_p6 }
  0x6f   : > { %666 = shalt.err (!%p663_p5)
}
  0x70   : > { %486 = dma.vmem_to_hbm [thread:$0]  (%p1061_p10), %s964_s30, 128, %s962_s15, %s298_s4  }
  0x71   : > { %s303_s21 = scalar_lea.sflag [#allocation9], %s954_s7  ;;  %s667_s5 = scalar_lea.vmem %s971_s8, 128 }
  0x72   : > { %p668_p11 = scmp.ne.s32.totalorder %s971_s8, %s667_s5  ;;  %s783_s23 = smov [#allocation8]  }
  0x73   : > { %s671_s9 = sshll.u32 %s783_s23, 4  ;;  %s672_s9 = int_to_ptr.vmem [resolvable:$false] %s671_s9 }
  0x74   : > { %p669_p1 = pnand %p668_p11, %p1061_p10  ;;  %s673_s25 = scalar_lea.vmem %s672_s9, 256 }
  0x75   : > { %p674_p4 = scmp.lt.s32.totalorder %s971_s8, %s672_s9  ;;  %p675_p13 = scmp.lt.s32.totalorder %s673_s25, %s667_s5 }
  0x76   : > { %p670_p7 = pneg %p669_p1 }
  0x77   : > { %p676_p9 = por %p675_p13, %p674_p4 }
  0x79   : > { %p677_p6 = pnand %p676_p9, %p670_p7 }
  0x7b   : > { %680 = shalt.err (!%p677_p6)
}
  0x7c   : > { %s681_s7 = scalar_lea.hbm %s969_s17, 128  ;;  %s685_s4 = scalar_lea.hbm %s1048_s3, 256 }
  0x7d   : > { %p682_p12 = scmp.ne.s32.totalorder %s969_s17, %s681_s7  ;;  %p686_p2 = scmp.lt.u32.totalorder %s969_s17, %s1048_s3 }
  0x7e   : > { %p687_p3 = scmp.lt.u32.totalorder %s685_s4, %s681_s7  ;;  %p689_p11 = scmp.lt.u32.totalorder %s681_s7, %s969_s17 }
  0x7f   : > { %p683_p0 = pnand %p682_p12, %p1061_p10 }
  0x80   : > { %p688_p5 = por %p687_p3, %p686_p2 }
  0x81   : > { %p684_p8 = pneg %p683_p0 }
  0x82   : > { %p690_p1 = por %p689_p11, %p688_p5 }
  0x84   : > { %p691_p7 = pnand %p690_p1, %p684_p8 }
  0x86   : > { %694 = shalt.err (!%p691_p7)
}
  0x87   : > { %487 = dma.vmem_to_hbm [thread:$0]  (%p1061_p10), %s971_s8, 128, %s969_s17, %s303_s21  }
  0x88 PF: > { %s341_s6 = sand.u32 1, %s750_s12   ;;  %p1062_p4 = scmp.ne.s32.totalorder %s1054_s29, 0 }
  0x89   : > { %p1063_p13 = scmp.ge.s32.totalorder %s778_s19, 2  ;;  %s342_s10 = scalar_lea.sflag [#allocation4], %s341_s6 }
  0x8b   : > { %p498_p9 = pnand %p1063_p13, %p1062_p4 }
  0x8d   : > { %740 = dma.done.wait (!%p498_p9), %s342_s10, 128  }
  0x8e   : > { %742 = vsyncadd (!%p498_p9), %s342_s10, 4294967168  ;;  %s351_s11 = scalar_lea.sflag [#allocation9], %s341_s6 }
  0x8f   : > { %744 = dma.done.wait (!%p498_p9), %s351_s11, 128  }
  0x90   : > { %746 = vsyncadd (!%p498_p9), %s351_s11, 4294967168  ;;  %s26_s19 = sadd.s32 1, %s778_s19   ;;  %s1064_s12 = smov %s754_s13 }
  0x91   : > { %p23_p6 = scmp.ge.s32.totalorder %s26_s19, 4   ;;  %s1065_s13 = smov %s758_s14 }
  0x92   : > { %s1066_s14 = smov %s862_s27  ;;  %s1067_s15 = smov %s766_s16 }
  0x93   : > { %s1035_s16 = smov 0   ;;  %s1068_s17 = smov %s774_s18 }
  0x94   : > { %s1069_s18 = smov %s1071_s22  ;;  %25 = sbr.rel (!%p23_p6) target bundleno = 11 (0xb), region = 107 }
  0x9b   :  { %356 = vsyncpa [#allocation3], 1 }
  0x9c   :  { %358 = vsyncpa [#allocation3 + $0x1], 1 }
  0x9d   :  { %359 = vsyncpa [#allocation6], 1 }
  0x9e   :  { %361 = vsyncpa [#allocation6 + $0x1], 1 }
  0x9f   :  { %362 = vsyncpa [#allocation4], 1 }
  0xa0   :  { %364 = vsyncpa [#allocation4 + $0x1], 1 }
  0xa1   :  { %365 = vsyncpa [#allocation9], 1 }
  0xa2   :  { %367 = vsyncpa [#allocation9 + $0x1], 1 }

</bundles_post_ra>
